<compile_context>
chip_gen: v7x
topology: tpu7x:2x2x1
jax: 0.10.0
libtpu: 0.0.40
codegen_flags: <defaults>
</compile_context>

<pallas_src>
import functools

import jax
import jax.numpy as jnp
from jax.experimental import pallas as pl
from jax.experimental.pallas import tpu as pltpu


_LANES = 512              # lane width of the 2-D view (multiple of 128)
_MAX_BLOCK_ROWS = 1024    # (1024, 512) f32 block = 2 MiB per buffer
_MIN_PALLAS_ELEMS = 2048  # below this, fused XLA beats pallas_call overhead


def _round_up(x: int, m: int) -> int:
    return ((x + m - 1) // m) * m


def _spl_kernel(thr_ref, x_ref, v_ref, loss_ref, *, n_total: int):
    """One grid step: selection mask + masked partial sum over a (tm, 512) tile."""
    r = pl.program_id(0)

    @pl.when(r == 0)
    def _init():
        loss_ref[...] = jnp.zeros_like(loss_ref)

    bm, bn = x_ref.shape
    x = x_ref[...].astype(jnp.float32)
    thr = thr_ref[0]                                  # pre-scaled threshold (SMEM)

    # Mask elements past the true flat length (wrapper pad and/or the OOB rows
    # of a partial edge block).
    row = r * bm + jax.lax.broadcasted_iota(jnp.int32, (bm, bn), 0)
    col = jax.lax.broadcasted_iota(jnp.int32, (bm, bn), 1)
    valid = row * bn + col < n_total

    keep = jnp.logical_and(x < thr, valid)
    v_ref[...] = keep.astype(jnp.int8)

    # Per-step reduction straight into the resident (1, 1) loss block.
    loss_ref[...] += jnp.sum(jnp.where(keep, x, jnp.float32(0.0)))


def spl_select_and_sum(
    super_loss: jax.Array,
    threshold,
    *,
    max_block_rows: int = _MAX_BLOCK_ROWS,
    min_pallas_elems: int = _MIN_PALLAS_ELEMS,
):
    """Pallas TPU implementation of the SPLoss math.

    Returns (v, loss):
        v    = (super_loss * 1e-7 < threshold).astype(int8)   (same shape as input)
        loss = sum(super_loss * v)                             (0-d scalar)
    """
    orig_shape = super_loss.shape
    x_flat = super_loss.reshape(-1)
    n = x_flat.shape[0]
    thr_scaled = float(threshold) * 1e7

    if n == 0:  # degenerate-input guard
        return jnp.zeros(orig_shape, jnp.int8), jnp.zeros((), super_loss.dtype)

    if n < min_pallas_elems:
        # Batch-sized inputs are overhead dominated: let XLA fuse it.
        xf = x_flat.astype(jnp.float32)
        keep = xf < jnp.asarray(thr_scaled, jnp.float32)
        v = keep.astype(jnp.int8).reshape(orig_shape)
        loss = jnp.sum(jnp.where(keep, xf, jnp.float32(0.0)))
        return v, loss.astype(super_loss.dtype)

    rows = -(-n // _LANES)
    n_pad = rows * _LANES
    if n_pad != n:
        # Pad only when N doesn't factor into (rows, 512); one extra pass over x.
        x2d = jnp.pad(x_flat, (0, n_pad - n)).reshape(rows, _LANES)
    else:
        x2d = x_flat.reshape(rows, _LANES)

    if rows <= max_block_rows:
        tm = rows                               # single block == full array dims
    else:
        tm = _round_up(max_block_rows, 8)       # sublane-aligned row tile
    grid = -(-rows // tm)

    thr_arr = jnp.asarray([thr_scaled], dtype=jnp.float32)

    v2d, loss = pl.pallas_call(
        functools.partial(_spl_kernel, n_total=n),
        out_shape=(
            jax.ShapeDtypeStruct((rows, _LANES), jnp.int8),
            jax.ShapeDtypeStruct((1, 1), jnp.float32),
        ),
        grid_spec=pltpu.PrefetchScalarGridSpec(
            num_scalar_prefetch=0,
            grid=(grid,),
            in_specs=[
                pl.BlockSpec(memory_space=pltpu.MemorySpace.SMEM),  # threshold
                pl.BlockSpec((tm, _LANES), lambda r: (r, 0)),       # x tile
            ],
            out_specs=(
                pl.BlockSpec((tm, _LANES), lambda r: (r, 0)),       # v tile (int8)
                pl.BlockSpec((1, 1), lambda r: (0, 0)),             # loss accumulator
            ),
        ),
        compiler_params=pltpu.CompilerParams(
            dimension_semantics=("arbitrary",),   # streaming/reduction axis
        ),
    )(thr_arr, x2d)

    v_flat = v2d.reshape(-1)
    if n_pad != n:
        v_flat = v_flat[:n]                      # only when the wrapper padded
    return v_flat.reshape(orig_shape), loss[0, 0].astype(super_loss.dtype)


class SPLoss:
    """JAX/Pallas equivalent of the PyTorch SPLoss module."""

    def __init__(self, n_samples: int, threshold: float = 5e-7, growing_factor: float = 1.3):
        self.threshold = float(threshold)
        self.growing_factor = float(growing_factor)
        self.v = jnp.zeros((n_samples,), dtype=jnp.int32)

    def forward(self, super_loss: jax.Array, index: jax.Array) -> jax.Array:
        v, loss = spl_select_and_sum(super_loss, self.threshold)
        # TODO(synk): stateful arbitrary-index scatter self.v[index] = v is
        # plain-JAX glue; it is not expressible inside the Pallas grid.
        self.v = self.v.at[index].set(v.astype(self.v.dtype))
        return loss

    __call__ = forward

    def increase_threshold(self):
        self.threshold *= self.growing_factor


if __name__ == "__main__":
    key = jax.random.PRNGKey(0)
    k1, k2, k3, k4 = jax.random.split(key, 4)

    threshold = 5e-7

    # --- Pallas path through the module (2560 = 5 rows x 512 lanes; no pad).
    n_samples = 4096
    batch = 2560
    super_loss = jax.random.uniform(k1, (batch,), jnp.float32, 0.0, 10.0)
    index = jax.random.permutation(k2, n_samples)[:batch]

    module = SPLoss(n_samples, threshold=threshold, growing_factor=1.3)
    loss = jax.block_until_ready(module(super_loss, index))
    v_state = jax.block_until_ready(module.v)

    v_ref = (super_loss * 1e-7 < threshold).astype(jnp.int32)
    loss_ref = jnp.sum(super_loss * v_ref)
    v_state_ref = jnp.zeros((n_samples,), jnp.int32).at[index].set(v_ref)

    assert loss.shape == ()
    assert jnp.allclose(loss, loss_ref, rtol=1e-5, atol=1e-3), (loss, loss_ref)
    assert jnp.array_equal(v_state, v_state_ref)

    # --- Pallas path with a ragged length and a multi-step grid
    # (exercises wrapper pad, flat-index tail mask, edge row-block, and the
    #  resident loss accumulator across grid steps).
    super_loss2 = jax.random.uniform(k3, (9000,), jnp.float32, 0.0, 10.0)
    v2, loss2 = spl_select_and_sum(super_loss2, threshold, max_block_rows=8)
    loss2 = jax.block_until_ready(loss2)
    v2_ref = (super_loss2 * 1e-7 < threshold).astype(jnp.int8)
    assert jnp.array_equal(v2, v2_ref)
    assert jnp.allclose(loss2, jnp.sum(super_loss2 * v2_ref), rtol=1e-5, atol=1e-3)

    # --- Small-batch fast path (overhead-dominated sizes skip pallas_call).
    super_loss3 = jax.random.uniform(k4, (37,), jnp.float32, 0.0, 10.0)
    v3, loss3 = spl_select_and_sum(super_loss3, threshold)
    loss3 = jax.block_until_ready(loss3)
    v3_ref = (super_loss3 * 1e-7 < threshold).astype(jnp.int8)
    assert jnp.array_equal(v3, v3_ref)
    assert jnp.allclose(loss3, jnp.sum(super_loss3 * v3_ref), rtol=1e-5, atol=1e-3)

    print("KERNEL_OK")
</pallas_src>

<mosaic_0001>
module attributes {stable_mosaic.version = 11 : i64} {
  func.func @_spl_kernel(%arg0: i32, %arg1: memref<1xf32, #tpu.memory_space<smem>>, %arg2: memref<5x512xf32, #tpu.memory_space<vmem>>, %arg3: memref<5x512xi8, #tpu.memory_space<vmem>>, %arg4: memref<1x1xf32, #tpu.memory_space<vmem>>) attributes {dimension_semantics = [#tpu.dimension_semantics<arbitrary>], iteration_bounds = array<i64: 1>, scalar_prefetch = 0 : i64, scratch_operands = 0 : i64, tpu.core_type = #tpu.core_type<tc>, window_params = [{transform_indices = @transform_0, window_bounds = array<i64: 1>}, {transform_indices = @transform_1, window_bounds = array<i64: 5, 512>}, {transform_indices = @transform_2, window_bounds = array<i64: 5, 512>}, {pipeline_mode = #tpu.pipeline_mode<synchronous>, transform_indices = @transform_3, window_bounds = array<i64: 1, 1>}]} {
    %c0_i32 = arith.constant 0 : i32
    %0 = arith.cmpi eq, %arg0, %c0_i32 : i32
    %1 = arith.extui %0 : i1 to i32
    %c0_i32_0 = arith.constant 0 : i32
    %2 = arith.cmpi ne, %1, %c0_i32_0 : i32
    scf.if %2 {
      %cst_10 = arith.constant 0.000000e+00 : f32
      %30 = vector.broadcast %cst_10 : f32 to vector<1x1xf32>
      %c0_11 = arith.constant 0 : index
      %c0_12 = arith.constant 0 : index
      %31 = vector.load %arg4[%c0_11, %c0_12] : memref<1x1xf32, #tpu.memory_space<vmem>>, vector<1x1xf32>
      tpu.vector_store %arg4[%c0_11, %c0_12], %30 {strides = array<i32>} : memref<1x1xf32, #tpu.memory_space<vmem>>, vector<1x1xf32>,
    } else {
    }
    %c0 = arith.constant 0 : index
    %c0_1 = arith.constant 0 : index
    %3 = vector.load %arg2[%c0, %c0_1] : memref<5x512xf32, #tpu.memory_space<vmem>>, vector<5x512xf32>
    %c0_2 = arith.constant 0 : index
    %4 = memref.load %arg1[%c0_2] : memref<1xf32, #tpu.memory_space<smem>>
    %c5_i32 = arith.constant 5 : i32
    %5 = arith.muli %arg0, %c5_i32 : i32
    %6 = tpu.iota {dimensions = array<i32: 0>} : vector<5x512xi32>
    %7 = vector.broadcast %5 : i32 to vector<5x512xi32>
    %8 = arith.addi %7, %6 : vector<5x512xi32>
    %9 = tpu.iota {dimensions = array<i32: 1>} : vector<5x512xi32>
    %c512_i32 = arith.constant 512 : i32
    %10 = vector.broadcast %c512_i32 : i32 to vector<5x512xi32>
    %11 = arith.muli %8, %10 : vector<5x512xi32>
    %12 = arith.addi %11, %9 : vector<5x512xi32>
    %c2560_i32 = arith.constant 2560 : i32
    %13 = vector.broadcast %c2560_i32 : i32 to vector<5x512xi32>
    %14 = arith.cmpi slt, %12, %13 : vector<5x512xi32>
    %15 = vector.broadcast %4 : f32 to vector<5x512xf32>
    %16 = arith.cmpf olt, %3, %15 : vector<5x512xf32>
    %17 = arith.andi %16, %14 : vector<5x512xi1>
    %18 = arith.extui %17 : vector<5x512xi1> to vector<5x512xi8>
    %c0_3 = arith.constant 0 : index
    %c0_4 = arith.constant 0 : index
    %19 = vector.load %arg3[%c0_3, %c0_4] : memref<5x512xi8, #tpu.memory_space<vmem>>, vector<5x512xi8>
    tpu.vector_store %arg3[%c0_3, %c0_4], %18 {strides = array<i32>} : memref<5x512xi8, #tpu.memory_space<vmem>>, vector<5x512xi8>,
    %c0_5 = arith.constant 0 : index
    %c0_6 = arith.constant 0 : index
    %20 = vector.load %arg4[%c0_5, %c0_6] : memref<1x1xf32, #tpu.memory_space<vmem>>, vector<1x1xf32>
    %cst = arith.constant 0.000000e+00 : f32
    %21 = vector.broadcast %cst : f32 to vector<5x512xf32>
    %22 = arith.select %17, %3, %21 : vector<5x512xi1>, vector<5x512xf32>
    %23 = vector.shape_cast %22 : vector<5x512xf32> to vector<1x5x512xf32>
    %cst_7 = arith.constant dense<0.000000e+00> : vector<1xf32>
    %24 = vector.multi_reduction <add>, %23, %cst_7 [1, 2] : vector<1x5x512xf32> to vector<1xf32>
    %25 = vector.shape_cast %24 : vector<1xf32> to vector<1x1x1xf32>
    %26 = vector.extract %25[0, 0, 0] : f32 from vector<1x1x1xf32>
    %27 = vector.broadcast %26 : f32 to vector<1x1xf32>
    %28 = arith.addf %20, %27 : vector<1x1xf32>
    %c0_8 = arith.constant 0 : index
    %c0_9 = arith.constant 0 : index
    %29 = vector.load %arg4[%c0_8, %c0_9] : memref<1x1xf32, #tpu.memory_space<vmem>>, vector<1x1xf32>
    tpu.vector_store %arg4[%c0_8, %c0_9], %28 {strides = array<i32>} : memref<1x1xf32, #tpu.memory_space<vmem>>, vector<1x1xf32>,
    return
  }
  func.func @transform_0(%arg0: i32) -> i32 {
    %c0_i32 = arith.constant 0 : i32
    %c0_i32_0 = arith.constant 0 : i32
    return %c0_i32 : i32
  }
  func.func @transform_1(%arg0: i32) -> (i32, i32) {
    %c0_i32 = arith.constant 0 : i32
    %c0_i32_0 = arith.constant 0 : i32
    return %arg0, %c0_i32 : i32, i32
  }
  func.func @transform_2(%arg0: i32) -> (i32, i32) {
    %c0_i32 = arith.constant 0 : i32
    %c0_i32_0 = arith.constant 0 : i32
    return %arg0, %c0_i32 : i32, i32
  }
  func.func @transform_3(%arg0: i32) -> (i32, i32) {
    %c0_i32 = arith.constant 0 : i32
    %c0_i32_0 = arith.constant 0 : i32
    %c0_i32_1 = arith.constant 0 : i32
    return %c0_i32, %c0_i32_0 : i32, i32
  }
}

</mosaic_0001>

<bundles_post_ra>
// kernel: tpu_custom_call.1
= control target key start
LH: loop header
LB: loop body
LE: loop exit
PB: predicated region body
PF: predicated region fallthrough
CT: control target
= control target key end

     0   :  { %10 = vsyncpa [#allocation4], 0  ;;  %s337_s0 = inlined_call_operand.<no memory space> [shape: f32[1], index: 0, kind: input, shape index: {}]   ;;  %s338_s1 = inlined_call_operand.hbm [shape: f32[5,512], index: 1, kind: input, shape index: {}]   ;;  %s339_s2 = inlined_call_operand.hbm [shape: s8[5,512], index: 2, kind: output, shape index: {0}]   ;;  %s340_s3 = inlined_call_operand.hbm [shape: f32[1,1], index: 3, kind: output, shape index: {1}]  }
   0x1   :  { %11 = vsyncpa [#allocation5], 0 }
   0x2   :  { %12 = vsyncpa [#allocation8], 0  ;;  %s240_s12 = smov [#allocation3]   ;;  %s168_s16 = scalar_lea.hbm %s338_s1, 512 }
   0x3   :  { %s21_s13 = sshll.u32 %s240_s12, 4  ;;  %p169_p0 = scmp.ne.s32.totalorder %s338_s1, %s168_s16  ;;  %s22_s13 = int_to_ptr.vmem [resolvable:$true] %s21_s13 }
   0x4   :  { %p172_p1 = scmp.lt.u32.totalorder %s168_s16, %s338_s1 }
   0x6   :  { %p174_p2 = pnand %p172_p1, %p169_p0 }
   0x8   :  { %177 = shalt.err (!%p174_p2)
}
   0x9   :  { %s178_s21 = scalar_lea.vmem %s22_s13, 512  ;;  %p183_p4 = scmp.lt.s32.totalorder %s22_s13, %s22_s13 }
   0xa   :  { %p179_p3 = scmp.ne.s32.totalorder %s22_s13, %s178_s21  ;;  %p184_p5 = scmp.lt.s32.totalorder %s178_s21, %s178_s21 }
   0xc   :  { %p185_p6 = por %p184_p5, %p183_p4 }
   0xe   :  { %p186_p7 = pnand %p185_p6, %p179_p3 }
  0x10   :  { %189 = shalt.err (!%p186_p7)
}
  0x11   :  { %24 = dma.hbm_to_vmem [thread:$0]  %s338_s1, 512, %s22_s13, [#allocation4]  }
  0x12   :  { %234 = dma.done.wait [#allocation4], 512  }
  0x13   :  { %235 = vsyncadd [#allocation4], 4294966784  ;;  %vm341_vm0 = vcmask 0   ;;  %v42_v0 = vlaneseq  ;;  %v241_v1 = vmov 0.0   ;;  %v60_v8 = vstv %s337_s0  ;;  %v36_v13 = vld [vmem:[#allocation3] sm:$0x1f] }
  0x14   :  { %35 = vst.msk [vmem:[#allocation7] sm:$0x1] %vm341_vm0, %v241_v1  ;;  %v37_v14 = vld [vmem:[#allocation3 + $0x8] sm:$0x1f]  ;;  %v38_v15 = vld [vmem:[#allocation3 + $0x10] sm:$0x1f]  ;;  %vm61_vm5 = vcmp.lt.f32.partialorder %v36_v13, %v60_v8 }
  0x15   :  { %v43_v2 = vshrl.u32 %v42_v0, 7  ;;  %v47_v3 = vand.u32 127, %v42_v0  ;;  %v39_v16 = vld [vmem:[#allocation3 + $0x18] sm:$0x1f]  ;;  %vm111_vm3 = vcmask 1044480   ;;  %vm62_vm6 = vcmp.lt.f32.partialorder %v37_v14, %v60_v8  ;;  %v103_v43 = vld [vmem:[#allocation6] sm:$0xff] }
  0x16   :  { %vm63_vm7 = vcmp.lt.f32.partialorder %v38_v15, %v60_v8  ;;  %vm64_vm9 = vcmp.lt.f32.partialorder %v39_v16, %v60_v8  ;;  %v242_v31 = vmov 0   ;;  %vm100_vm0 = vsmask.f32 7168  ;;  %s243_s0 = smov [#allocation6]  }
  0x17   :  { %v48_v4 = vadd.s32 128, %v47_v3  ;;  %v49_v5 = vadd.s32 256, %v47_v3  ;;  %v50_v6 = vadd.s32 384, %v47_v3  ;;  %v51_v7 = vmul.u32 512, %v43_v2  ;;  %s138_s1 = sshll.u32 %s243_s0, 4  ;;  %s139_s1 = int_to_ptr.vmem [resolvable:$true] %s138_s1 }
  0x18   :  { %s190_s26 = scalar_lea.vmem %s139_s1, 128  ;;  %p195_p9 = scmp.lt.s32.totalorder %s139_s1, %s139_s1 }
  0x19   :  { %v52_v9 = vadd.s32 %v51_v7, %v47_v3  ;;  %v53_v10 = vadd.s32 %v51_v7, %v48_v4  ;;  %v54_v11 = vadd.s32 %v51_v7, %v49_v5  ;;  %v55_v12 = vadd.s32 %v51_v7, %v50_v6  ;;  %p191_p8 = scmp.ne.s32.totalorder %s139_s1, %s190_s26  ;;  %p196_p10 = scmp.lt.s32.totalorder %s190_s26, %s190_s26 }
  0x1b   :  { %vm56_vm1 = vcmp.lt.s32.totalorder %v52_v9, 2560  ;;  %vm57_vm2 = vcmp.lt.s32.totalorder %v53_v10, 2560  ;;  %vm58_vm4 = vcmp.lt.s32.totalorder %v54_v11, 2560  ;;  %vm59_vm8 = vcmp.lt.s32.totalorder %v55_v12, 2560  ;;  %p197_p11 = por %p196_p10, %p195_p9 }
  0x1c   :  { %vm281_vm10 = vmand %vm61_vm5, %vm56_vm1 }
  0x1d   :  { %vm285_vm11 = vmand %vm62_vm6, %vm57_vm2  ;;  %v107_v19 = vsel %vm281_vm10, %v36_v13, 0.0  ;;  %p198_p12 = pnand %p197_p11, %p191_p8 }
  0x1e   :  { %vm67_vm12 = vmand %vm63_vm7, %vm58_vm4  ;;  %v108_v20 = vsel %vm285_vm11, %v37_v14, 0.0  ;;  %v112_v21 = vsel %vm111_vm3, %v107_v19, 0.0  ;;  %vm88_vm7 = vcmask 1041408  }
  0x1f   :  { %vm294_vm13 = vmand %vm64_vm9, %vm59_vm8  ;;  %v109_v23 = vsel %vm67_vm12, %v38_v15, 0.0  ;;  %v113_v24 = vsel %vm111_vm3, %v108_v20, 0.0  ;;  %vm89_vm8 = vsmask.f32 1024  ;;  %vm91_vm9 = vcmask 1043458  }
  0x20   :  { %v110_v25 = vsel %vm294_vm13, %v39_v16, 0.0  ;;  %v114_v26 = vadd.f32 %v113_v24, %v112_v21  ;;  %v115_v27 = vsel %vm111_vm3, %v109_v23, 0.0  ;;  %vm73_vm14 = vmpackc.low %vm67_vm12, %vm67_vm12  ;;  %vm92_vm12 = vsmask.f32 3072 }
  0x21   :  { %v117_v28 = vsel %vm111_vm3, %v110_v25, 0.0  ;;  %vm74_vm15 = vmpackc.even %vm73_vm14, %vm73_vm14  ;;  %vm95_vm14 = vcmask 1045508  }
  0x22   :  { %v116_v29 = vadd.f32 %v115_v27, %v114_v26  ;;  %vm75_vm1 = vmpackc.low %vm294_vm13, %vm294_vm13  ;;  %v79_v32 = vsel %vm74_vm15, 16843009, %v242_v31  ;;  %vm96_vm15 = vsmask.f32 5120 }
  0x23   :  { %vm76_vm2 = vmpackc.even %vm75_vm1, %vm75_vm1  ;;  %v83_v33 = vunpack.c.0.s8 %v79_v32 }
  0x24   :  { %v118_v30 = vadd.f32 %v117_v28, %v116_v29  ;;  %v80_v34 = vsel %vm76_vm2, 16843009, %v242_v31  ;;  %vm69_vm3 = vmpackc.low %vm281_vm10, %vm281_vm10  ;;  %vm99_vm2 = vcmask 1047558  }
  0x25   :  { %v84_v35 = vunpack.c.0.s8 %v80_v34  ;;  %vm71_vm4 = vmpackc.low %vm285_vm11, %vm285_vm11 }
  0x26   :  { %119 = vadd.xlane.f32.xlu0 %v118_v30  ;;  %vm70_vm5 = vmpackc.even %vm69_vm3, %vm69_vm3 }
  0x27   :  { %v86_v36 = vpack.c.b16 %v84_v35, %v83_v33  ;;  %vm72_vm6 = vmpackc.even %vm71_vm4, %vm71_vm4  ;;  %v77_v37 = vsel %vm70_vm5, 16843009, %v242_v31 }
  0x28   :  { %v78_v38 = vsel %vm72_vm6, 16843009, %v242_v31  ;;  %v81_v39 = vunpack.c.0.s8 %v77_v37  ;;  %vm90_vm13 = vmand %vm88_vm7, %vm89_vm8 }
  0x29   :  { %v82_v40 = vunpack.c.0.s8 %v78_v38  ;;  %vm93_vm1 = vmand %vm91_vm9, %vm92_vm12 }
  0x2a   :  { %vm94_vm10 = vmor %vm93_vm1, %vm90_vm13 }
  0x2b   :  { %v85_v41 = vpack.c.b16 %v82_v40, %v81_v39  ;;  %vm97_vm11 = vmand %vm95_vm14, %vm96_vm15 }
  0x2c   :  { %vm98_vm3 = vmor %vm97_vm11, %vm94_vm10 }
  0x2d   :  { %v87_v42 = vpack.c.b8 %v86_v36, %v85_v41  ;;  %vm101_vm4 = vmand %vm99_vm2, %vm100_vm0 }
  0x2e   :  { %vm102_vm5 = vmor %vm101_vm4, %vm98_vm3 }
  0x2f   :  { %v104_v44 = vsel %vm102_vm5, %v87_v42, %v103_v43 }
  0x30   :  { %105 = vst [vmem:[#allocation6] sm:$0xff] %v104_v44 }
  0x31   :  { %201 = shalt.err (!%p198_p12)
}
  0x32   :  { %s202_s29 = scalar_lea.hbm %s339_s2, 128 }
  0x33   :  { %p203_p13 = scmp.ne.s32.totalorder %s339_s2, %s202_s29  ;;  %p206_p0 = scmp.lt.u32.totalorder %s202_s29, %s339_s2 }
  0x35   :  { %p208_p1 = pnand %p206_p0, %p203_p13 }
  0x37   :  { %211 = shalt.err (!%p208_p1)
}
  0x38   :  { %141 = dma.vmem_to_hbm [thread:$0]  %s139_s1, 128, %s339_s2, [#allocation5]   ;;  %v106_v52 = vld [vmem:[#allocation7] sm:$0x1]  ;;  %vm348_vm0 = vcmask 0  }
  0x39   :  { %s244_s9 = smov [#allocation7]  }
  0x3a   :  { %s148_s10 = sshll.u32 %s244_s9, 4  ;;  %s149_s10 = int_to_ptr.vmem [resolvable:$true] %s148_s10 }
  0x3b   :  { %s212_s12 = scalar_lea.vmem %s149_s10, 16  ;;  %s216_s2 = scalar_lea.vmem %s149_s10, 32 }
  0x3c   :  { %p213_p2 = scmp.ne.s32.totalorder %s149_s10, %s212_s12  ;;  %p217_p3 = scmp.lt.s32.totalorder %s149_s10, %s149_s10 }
  0x3d   :  { %p218_p4 = scmp.lt.s32.totalorder %s216_s2, %s212_s12 }
  0x3f   :  { %p219_p5 = por %p218_p4, %p217_p3 }
  0x41   :  { %p220_p6 = pnand %p219_p5, %p213_p2 }
  0xb3   :  { %v120_v45 = vpop.xlane.xlu0 %119 }
  0xb4   :  { %v121_v46 = vrot.slane %v120_v45, 4 }
  0xb6   :  { %v122_v47 = vadd.f32 %v121_v46, %v120_v45 }
  0xb8   :  { %v123_v48 = vrot.slane %v122_v47, 2 }
  0xba   :  { %v124_v49 = vadd.f32 %v123_v48, %v122_v47 }
  0xbc   :  { %v125_v50 = vrot.slane %v124_v49, 1 }
  0xbe   :  { %v126_v51 = vadd.f32 %v125_v50, %v124_v49 }
  0xc0   :  { %161 = vpush %v126_v51 }
  0xf1   :  { %s162_s11 = spop %161 }
  0xf2   :  { %v128_v53 = vstv %s162_s11 }
  0xf3   :  { %v129_v54 = vadd.f32 %v128_v53, %v106_v52 }
  0xf5   :  { %131 = vst.msk [vmem:[#allocation7] sm:$0x1] %vm348_vm0, %v129_v54 }
  0xf6   :  { %223 = shalt.err (!%p220_p6)
}
  0xf7   :  { %s224_s15 = scalar_lea.hbm %s340_s3, 16 }
  0xf8   :  { %p225_p7 = scmp.ne.s32.totalorder %s340_s3, %s224_s15  ;;  %p228_p8 = scmp.lt.u32.totalorder %s224_s15, %s340_s3 }
  0xfa   :  { %p230_p9 = pnand %p228_p8, %p225_p7 }
  0xfc   :  { %233 = shalt.err (!%p230_p9)
}
  0xfd   :  { %151 = dma.vmem_to_hbm [thread:$0]  %s149_s10, 16, %s340_s3, [#allocation8]  }
  0xfe   :  { %236 = dma.done.wait [#allocation5], 128  }
  0xff   :  { %237 = vsyncadd [#allocation5], 4294967168 }
 0x100   :  { %238 = dma.done.wait [#allocation8], 16  }
 0x101   :  { %239 = vsyncadd [#allocation8], 4294967280 }
 0x102   :  { %158 = vsyncpa [#allocation4], 1 }
 0x103   :  { %159 = vsyncpa [#allocation5], 1 }
 0x104   :  { %160 = vsyncpa [#allocation8], 1 }

</bundles_post_ra>
